<compile_context>
chip_gen: v6e
topology: v6e:2x2x1
jax: 0.10.0
libtpu: 0.0.40
codegen_flags: <defaults>
</compile_context>

<pallas_src>
import functools

import jax
import jax.numpy as jnp
from jax.experimental import pallas as pl
from jax.experimental.pallas import tpu as pltpu


def _pad_up(n, m=128):
    return ((n + m - 1) // m) * m


def _sa_kernel(xq_ref, xkv_ref, wq_ref, wkv_ref, wp_ref, o_ref, *, kp):
    # xq_ref : (tq, D)      query rows of this (batch, q-tile) grid step
    # xkv_ref: (S,  D)      full sequence of this batch element (keys/values)
    # wq_ref : (D, Kp)      W_q with 1/sqrt(key_dim) folded in, zero-padded cols
    # wkv_ref: (D, Kp+Vp)   [W_k | W_v], each zero-padded to a 128 multiple
    # wp_ref : (Vp, Dout)   output projection, zero-padded rows
    # o_ref  : (tq, Dout)
    f32, bf16 = jnp.float32, jnp.bfloat16

    # Projections (contraction over the true D, f32 accumulation).
    q = jnp.dot(xq_ref[...], wq_ref[...], preferred_element_type=f32)      # (tq, Kp)
    kv = jnp.dot(xkv_ref[...], wkv_ref[...], preferred_element_type=f32)   # (S, Kp+Vp)
    k = kv[:, :kp]          # (S, Kp)  clean 128-lane split, no relayout
    v = kv[:, kp:]          # (S, Vp)

    # Scores q.K^T: bf16 MXU operands, f32 accumulation, no transpose copy.
    s = jnp.einsum("qc,kc->qk", q.astype(bf16), k.astype(bf16),
                   preferred_element_type=f32)                             # (tq, S)

    # Numerically stable softmax over the key axis (torch dim=2);
    # exp on EUP, approximate reciprocal on EUP instead of a VALU divide.
    s = s - jnp.max(s, axis=-1, keepdims=True)
    e = jnp.exp(s)
    attn = e * pl.reciprocal(jnp.sum(e, axis=-1, keepdims=True), approx=True)

    # Context and output projection, bf16 operands / f32 accumulation.
    ctx = jnp.dot(attn.astype(bf16), v.astype(bf16),
                  preferred_element_type=f32)                              # (tq, Vp)
    proj = jnp.dot(ctx.astype(bf16), wp_ref[...].astype(bf16),
                   preferred_element_type=f32)                             # (tq, Dout)

    # Residual add: re-read x from the ref (keeps its live range short).
    o_ref[...] = (xq_ref[...].astype(f32) + proj).astype(o_ref.dtype)


def prepare_sa_params(wq_t, wk_t, wv_t, wp_t, *, key_dim):
    """One-time parameter prep (hoisted out of the per-call path).

    w*_t are nn.Linear weights pre-transposed to (in, out).  Folds the
    1/sqrt(key_dim) scale into W_q, fuses W_k/W_v into one matmul weight and
    zero-pads the head dims to lane multiples (numerically exact).
    """
    D, kd = wq_t.shape
    vd = wv_t.shape[1]
    out_dim = wp_t.shape[1]
    assert wk_t.shape == (D, kd) and wv_t.shape == (D, vd)
    assert wp_t.shape == (vd, out_dim)
    assert out_dim == D, "residual add requires output_dim == input_dim"

    kp, vp = _pad_up(kd), _pad_up(vd)
    scale = 1.0 / (key_dim ** 0.5)

    def pad_cols(w, c):
        return jnp.pad(w, ((0, 0), (0, c - w.shape[1])))

    wq_p = pad_cols(wq_t * scale, kp)                                       # (D, Kp)
    wkv_p = jnp.concatenate([pad_cols(wk_t, kp), pad_cols(wv_t, vp)], 1)    # (D, Kp+Vp)
    wp_p = jnp.pad(wp_t, ((0, vp - vd), (0, 0)))                            # (Vp, Dout)
    return wq_p, wkv_p, wp_p, kp


def sa_layer(x, wq_p, wkv_p, wp_p, kp, *, q_tile=256):
    """x: (B, S, D); weights from prepare_sa_params()."""
    B, S, D = x.shape
    out_dim = wp_p.shape[1]
    tq = S if S <= q_tile else q_tile          # q-tile rows (multiple of 8 or == S)
    nq = pl.cdiv(S, tq)

    kernel = functools.partial(_sa_kernel, kp=kp)
    return pl.pallas_call(
        kernel,
        out_shape=jax.ShapeDtypeStruct((B, S, out_dim), x.dtype),
        grid=(B, nq),
        in_specs=[
            pl.BlockSpec((None, tq, D), lambda b, qi: (b, qi, 0)),   # x: query rows
            pl.BlockSpec((None, S, D), lambda b, qi: (b, 0, 0)),     # x: keys/values
            pl.BlockSpec(wq_p.shape, lambda b, qi: (0, 0)),          # resident weight
            pl.BlockSpec(wkv_p.shape, lambda b, qi: (0, 0)),         # resident weight
            pl.BlockSpec(wp_p.shape, lambda b, qi: (0, 0)),          # resident weight
        ],
        out_specs=pl.BlockSpec((None, tq, out_dim), lambda b, qi: (b, qi, 0)),
        compiler_params=pltpu.CompilerParams(
            dimension_semantics=("parallel", "parallel"),   # v7x: split across TCs
            vmem_limit_bytes=32 * 1024 * 1024,              # above v5e's 16 MiB default
        ),
    )(x, x, wq_p, wkv_p, wp_p)


def _trunc_normal(key, shape, std=0.002):
    # Haiku-style truncated normal: N(0, std) truncated at +/- 2 std.
    return std * jax.random.truncated_normal(key, -2.0, 2.0, shape, jnp.float32)


def _reference(x, wq_t, wk_t, wv_t, wp_t, key_dim):
    q = x @ wq_t
    k = x @ wk_t
    v = x @ wv_t
    s = jnp.einsum("bqd,bkd->bqk", q, k) / (key_dim ** 0.5)
    attn = jax.nn.softmax(s, axis=2)
    ctx = jnp.einsum("bqk,bkd->bqd", attn, v)
    return x + ctx @ wp_t


if __name__ == "__main__":
    # Small shapes consistent with the module's forward.
    batch, seq = 2, 8
    input_dim = output_dim = 32   # residual add forces output_dim == input_dim
    key_dim, value_dim = 16, 32

    root = jax.random.PRNGKey(0)
    k_x, k_q, k_k, k_v, k_p = jax.random.split(root, 5)

    x = jax.random.normal(k_x, (batch, seq, input_dim), jnp.float32)

    # nn.Linear weights are (out, in); build directly in transposed (in, out) form.
    wq_t = _trunc_normal(k_q, (input_dim, key_dim))
    wk_t = _trunc_normal(k_k, (input_dim, key_dim))
    wv_t = _trunc_normal(k_v, (input_dim, value_dim))
    wp_t = _trunc_normal(k_p, (value_dim, output_dim))

    # One-time weight prep (would be cached alongside the params in practice).
    wq_p, wkv_p, wp_p, kp = prepare_sa_params(wq_t, wk_t, wv_t, wp_t, key_dim=key_dim)

    out = sa_layer(x, wq_p, wkv_p, wp_p, kp)
    out = jax.block_until_ready(out)

    ref = _reference(x, wq_t, wk_t, wv_t, wp_t, key_dim)
    assert out.shape == (batch, seq, output_dim)
    # bf16 MXU operands + approx reciprocal => compare at 1e-4.
    assert jnp.allclose(out, ref, atol=1e-4, rtol=1e-4), float(
        jnp.max(jnp.abs(out - ref)))

    print("KERNEL_OK")
</pallas_src>

<mosaic_0001>
module attributes {stable_mosaic.version = 11 : i64} {
  func.func @_sa_kernel(%arg0: i32, %arg1: i32, %arg2: memref<1x8x32xf32, #tpu.memory_space<vmem>>, %arg3: memref<1x8x32xf32, #tpu.memory_space<vmem>>, %arg4: memref<32x128xf32, #tpu.memory_space<vmem>>, %arg5: memref<32x256xf32, #tpu.memory_space<vmem>>, %arg6: memref<128x32xf32, #tpu.memory_space<vmem>>, %arg7: memref<1x8x32xf32, #tpu.memory_space<vmem>>) attributes {dimension_semantics = [#tpu.dimension_semantics<parallel>, #tpu.dimension_semantics<parallel>], iteration_bounds = array<i64: 2, 1>, scalar_prefetch = 0 : i64, scratch_operands = 0 : i64, tpu.core_type = #tpu.core_type<tc>, window_params = [{transform_indices = @transform_0, window_bounds = array<i64: 1, 8, 32>}, {transform_indices = @transform_1, window_bounds = array<i64: 1, 8, 32>}, {pipeline_mode = #tpu.pipeline_mode<synchronous>, transform_indices = @transform_2, window_bounds = array<i64: 32, 128>}, {pipeline_mode = #tpu.pipeline_mode<synchronous>, transform_indices = @transform_3, window_bounds = array<i64: 32, 256>}, {pipeline_mode = #tpu.pipeline_mode<synchronous>, transform_indices = @transform_4, window_bounds = array<i64: 128, 32>}, {transform_indices = @transform_5, window_bounds = array<i64: 1, 8, 32>}]} {
    %c0 = arith.constant 0 : index
    %c0_0 = arith.constant 0 : index
    %c0_1 = arith.constant 0 : index
    %0 = vector.load %arg2[%c0, %c0_0, %c0_1] : memref<1x8x32xf32, #tpu.memory_space<vmem>>, vector<1x8x32xf32>
    %1 = vector.shape_cast %0 : vector<1x8x32xf32> to vector<8x32xf32>
    %c0_2 = arith.constant 0 : index
    %c0_3 = arith.constant 0 : index
    %2 = vector.load %arg4[%c0_2, %c0_3] : memref<32x128xf32, #tpu.memory_space<vmem>>, vector<32x128xf32>
    %cst = arith.constant dense<0.000000e+00> : vector<8x128xf32>
    %3 = tpu.matmul %1, %2, %cst {dimension_numbers = #tpu.dot_dimension_numbers<[1], [0], [0], [1], [0, 0, 1, 1], [], []>} : vector<8x32xf32>, vector<32x128xf32>, vector<8x128xf32> -> vector<8x128xf32>
    %c0_4 = arith.constant 0 : index
    %c0_5 = arith.constant 0 : index
    %c0_6 = arith.constant 0 : index
    %4 = vector.load %arg3[%c0_4, %c0_5, %c0_6] : memref<1x8x32xf32, #tpu.memory_space<vmem>>, vector<1x8x32xf32>
    %5 = vector.shape_cast %4 : vector<1x8x32xf32> to vector<8x32xf32>
    %c0_7 = arith.constant 0 : index
    %c0_8 = arith.constant 0 : index
    %6 = vector.load %arg5[%c0_7, %c0_8] : memref<32x256xf32, #tpu.memory_space<vmem>>, vector<32x256xf32>
    %cst_9 = arith.constant dense<0.000000e+00> : vector<8x256xf32>
    %7 = tpu.matmul %5, %6, %cst_9 {dimension_numbers = #tpu.dot_dimension_numbers<[1], [0], [0], [1], [0, 0, 1, 1], [], []>} : vector<8x32xf32>, vector<32x256xf32>, vector<8x256xf32> -> vector<8x256xf32>
    %8 = vector.extract_strided_slice %7 {offsets = [0, 0], sizes = [8, 128], strides = [1, 1]} : vector<8x256xf32> to vector<8x128xf32>
    %9 = vector.extract_strided_slice %7 {offsets = [0, 128], sizes = [8, 128], strides = [1, 1]} : vector<8x256xf32> to vector<8x128xf32>
    %10 = arith.truncf %3 : vector<8x128xf32> to vector<8x128xbf16>
    %11 = arith.truncf %8 : vector<8x128xf32> to vector<8x128xbf16>
    "tpu.trace_start"() <{level = 10 : i32, message = "qc,kc->qk"}> : () -> ()
    %cst_10 = arith.constant dense<0.000000e+00> : vector<8x8xf32>
    %12 = tpu.matmul %10, %11, %cst_10 {dimension_numbers = #tpu.dot_dimension_numbers<[1], [1], [0], [0], [0, 0, 1, 0], [], []>} : vector<8x128xbf16>, vector<8x128xbf16>, vector<8x8xf32> -> vector<8x8xf32>
    "tpu.trace_stop"() : () -> ()
    %cst_11 = arith.constant dense<0xFF800000> : vector<8xf32>
    %13 = vector.multi_reduction <maximumf>, %12, %cst_11 [1] : vector<8x8xf32> to vector<8xf32>
    %14 = vector.shape_cast %13 : vector<8xf32> to vector<8x1xf32>
    %15 = vector.broadcast %14 : vector<8x1xf32> to vector<8x8xf32>
    %16 = arith.subf %12, %15 : vector<8x8xf32>
    %17 = math.exp %16 : vector<8x8xf32>
    %cst_12 = arith.constant dense<0.000000e+00> : vector<8xf32>
    %18 = vector.multi_reduction <add>, %17, %cst_12 [1] : vector<8x8xf32> to vector<8xf32>
    %19 = vector.shape_cast %18 : vector<8xf32> to vector<8x1xf32>
    %20 = tpu.reciprocal %19 {approx = true} : vector<8x1xf32> -> vector<8x1xf32>
    %21 = vector.broadcast %20 : vector<8x1xf32> to vector<8x8xf32>
    %22 = arith.mulf %17, %21 : vector<8x8xf32>
    %23 = arith.truncf %22 : vector<8x8xf32> to vector<8x8xbf16>
    %24 = arith.truncf %9 : vector<8x128xf32> to vector<8x128xbf16>
    %cst_13 = arith.constant dense<0.000000e+00> : vector<8x128xf32>
    %25 = tpu.matmul %23, %24, %cst_13 {dimension_numbers = #tpu.dot_dimension_numbers<[1], [0], [0], [1], [0, 0, 1, 1], [], []>} : vector<8x8xbf16>, vector<8x128xbf16>, vector<8x128xf32> -> vector<8x128xf32>
    %26 = arith.truncf %25 : vector<8x128xf32> to vector<8x128xbf16>
    %c0_14 = arith.constant 0 : index
    %c0_15 = arith.constant 0 : index
    %27 = vector.load %arg6[%c0_14, %c0_15] : memref<128x32xf32, #tpu.memory_space<vmem>>, vector<128x32xf32>
    %28 = arith.truncf %27 : vector<128x32xf32> to vector<128x32xbf16>
    %cst_16 = arith.constant dense<0.000000e+00> : vector<8x32xf32>
    %29 = tpu.matmul %26, %28, %cst_16 {dimension_numbers = #tpu.dot_dimension_numbers<[1], [0], [0], [1], [0, 0, 1, 1], [], []>} : vector<8x128xbf16>, vector<128x32xbf16>, vector<8x32xf32> -> vector<8x32xf32>
    %c0_17 = arith.constant 0 : index
    %c0_18 = arith.constant 0 : index
    %c0_19 = arith.constant 0 : index
    %30 = vector.load %arg2[%c0_17, %c0_18, %c0_19] : memref<1x8x32xf32, #tpu.memory_space<vmem>>, vector<1x8x32xf32>
    %31 = vector.shape_cast %30 : vector<1x8x32xf32> to vector<8x32xf32>
    %32 = arith.addf %31, %29 : vector<8x32xf32>
    %c0_20 = arith.constant 0 : index
    %c0_21 = arith.constant 0 : index
    %c0_22 = arith.constant 0 : index
    %33 = vector.load %arg7[%c0_20, %c0_21, %c0_22] : memref<1x8x32xf32, #tpu.memory_space<vmem>>, vector<1x8x32xf32>
    %34 = vector.shape_cast %33 : vector<1x8x32xf32> to vector<8x32xf32>
    %35 = vector.shape_cast %32 : vector<8x32xf32> to vector<1x8x32xf32>
    tpu.vector_store %arg7[%c0_20, %c0_21, %c0_22], %35 {strides = array<i32>} : memref<1x8x32xf32, #tpu.memory_space<vmem>>, vector<1x8x32xf32>,
    return
  }
  func.func @transform_0(%arg0: i32, %arg1: i32) -> (i32, i32, i32) {
    %c0_i32 = arith.constant 0 : i32
    %c0_i32_0 = arith.constant 0 : i32
    return %arg0, %arg1, %c0_i32 : i32, i32, i32
  }
  func.func @transform_1(%arg0: i32, %arg1: i32) -> (i32, i32, i32) {
    %c0_i32 = arith.constant 0 : i32
    %c0_i32_0 = arith.constant 0 : i32
    %c0_i32_1 = arith.constant 0 : i32
    return %arg0, %c0_i32, %c0_i32_0 : i32, i32, i32
  }
  func.func @transform_2(%arg0: i32, %arg1: i32) -> (i32, i32) {
    %c0_i32 = arith.constant 0 : i32
    %c0_i32_0 = arith.constant 0 : i32
    %c0_i32_1 = arith.constant 0 : i32
    return %c0_i32, %c0_i32_0 : i32, i32
  }
  func.func @transform_3(%arg0: i32, %arg1: i32) -> (i32, i32) {
    %c0_i32 = arith.constant 0 : i32
    %c0_i32_0 = arith.constant 0 : i32
    %c0_i32_1 = arith.constant 0 : i32
    return %c0_i32, %c0_i32_0 : i32, i32
  }
  func.func @transform_4(%arg0: i32, %arg1: i32) -> (i32, i32) {
    %c0_i32 = arith.constant 0 : i32
    %c0_i32_0 = arith.constant 0 : i32
    %c0_i32_1 = arith.constant 0 : i32
    return %c0_i32, %c0_i32_0 : i32, i32
  }
  func.func @transform_5(%arg0: i32, %arg1: i32) -> (i32, i32, i32) {
    %c0_i32 = arith.constant 0 : i32
    %c0_i32_0 = arith.constant 0 : i32
    return %arg0, %arg1, %c0_i32 : i32, i32, i32
  }
}

</mosaic_0001>

<bundles_post_ra>
// kernel: tpu_custom_call.1
= control target key start
LH: loop header
LB: loop body
LE: loop exit
PB: predicated region body
PF: predicated region fallthrough
CT: control target
= control target key end

     0   :  { %10 = vsyncpa [#allocation3], 0  ;;  %s1173_s0 = inlined_call_operand.vmem [shape: f32[2,8,32], index: 0, kind: input, shape index: {}]   ;;  %s1174_s1 = inlined_call_operand.vmem [shape: f32[2,8,32], index: 1, kind: input, shape index: {}]   ;;  %s1175_s2 = inlined_call_operand.vmem [shape: f32[32,128], index: 2, kind: input, shape index: {}]   ;;  %s1176_s3 = inlined_call_operand.vmem [shape: f32[32,256], index: 3, kind: input, shape index: {}]   ;;  %s1177_s4 = inlined_call_operand.vmem [shape: f32[128,32], index: 4, kind: input, shape index: {}]   ;;  %s1178_s5 = inlined_call_operand.hbm [shape: f32[2,8,32], index: 5, kind: output, shape index: {}]  }
   0x1   :  { %12 = vsyncpa [#allocation3 + $0x1], 0  ;;  %s942_s18 = smov 0   ;;  %s944_s19 = smov 0  }
   0x2   :  { %s946_s20 = smov 0   ;;  %s948_s21 = smov 0  }
   0x3   :  { %s950_s22 = smov 0   ;;  %s952_s23 = smov 0  }
   0x4 LB: > { %s694_s24 = sadd.s32 4294967295, %s907_s23   ;;  %s695_s25 = sadd.s32 4294967294, %s907_s23   ;;  %s907_s23 = sphi %s952_s23, %s18_s23   ;;  %s903_s22 = sphi %s950_s22, %s1185_s22   ;;  %s899_s21 = sphi %s948_s21, %s1184_s21   ;;  %s895_s20 = sphi %s946_s20, %s1183_s20   ;;  %s891_s19 = sphi %s944_s19, %s1182_s19   ;;  %s887_s18 = sphi %s942_s18, %s1181_s18  }
   0x5   : > { %s30_s26 = sadd.s32 1, %s903_s22  ;;  %s156_s27 = sadd.s32 1, %s895_s20 }
   0x6   : > { %p32_p0 = scmp.ge.s32.totalorder %s30_s26, 2  ;;  %p166_p1 = scmp.ne.s32.totalorder %s895_s20, %s891_s19 }
   0x7   : > { %p167_p2 = scmp.eq.s32.totalorder %s694_s24, 1  ;;  %p172_p3 = scmp.ne.s32.totalorder %s891_s19, %s887_s18 }
   0x8   : > { %s1187_s26 = smov (%p32_p0, %s30_s26), 0  ;;  %p173_p5 = scmp.eq.s32.totalorder %s695_s25, 1 }
   0x9   : > { %p982_p4 = por %p167_p2, %p166_p1  ;;  %s151_s29 = ssub.s32 %s903_s22, %s1187_s26 }
   0xa   : > { %p698_p6 = scmp.ge.s32.totalorder %s907_s23, 1  ;;  %p154_p7 = scmp.eq.s32.totalorder %s151_s29, 0 }
   0xb   : > { %p989_p8 = por %p173_p5, %p172_p3  ;;  %p217_p9 = scmp.lt.s32.totalorder %s907_s23, 3 }
   0xc   : > { %s995_s6 = scalar_select %p154_p7, %s895_s20, %s156_s27  }
   0xd   : > { %p218_p10 = pnand %p698_p6, %p217_p9 }
   0xe   : > { %p251_p11 = scmp.lt.s32.totalorder (!%p218_p10), %s899_s21, 1  ;;  %s706_s13 = sshll.u32 (!%p218_p10), %s899_s21, 7 }
   0xf   : > { %221 = sbr.rel (%p218_p10) target bundleno = 1150 (0x47e), region = 40  ;;  %s911_s29 = smov (!%p218_p10), [#allocation2]  }
  0x10   : > { %s835_s7 = sshll.u32 (!%p218_p10), %s911_s29, 4  ;;  %s836_s7 = int_to_ptr.vmem [resolvable:$false] %s835_s7 }
  0x11   : > { %s837_s8 = scalar_lea.vmem (!%p218_p10), %s836_s7, 256 }
  0x14   : > { %v267_v0 = vld [vmem:[%s1175_s2 + $0x18] sm:$0xff]  ;;  %v909_v1 = vmov 0.0   ;;  %v266_v2 = vld [vmem:[%s1175_s2 + $0x10] sm:$0xff]  ;;  %vm910_vm0 = vmmov 0   ;;  %s252_s11 = scalar_select %p251_p11, %s899_s21, 1  ;;  %v265_v3 = vld [vmem:[%s1175_s2 + $0x8] sm:$0xff] }
  0x15   : > { %727 = vmatprep.subr.mxu0 %v909_v1  ;;  %735 = vmatprep.mubr.msk.f32.mxu0 %vm910_vm0, %v909_v1  ;;  %v264_v4 = vld [vmem:[%s1175_s2] sm:$0xff]  ;;  %vm268_vm1 = vcmask 261120   ;;  %v350_v6 = vld [vmem:[%s1176_s3 + $0x38] sm:$0xff]  ;;  %v349_v7 = vld [vmem:[%s1176_s3 + $0x30] sm:$0xff]  ;;  %vm484_vm2 = vcmask 1043456   ;;  %vm467_vm3 = vcmask 64512  }
  0x16   : > { %728 = vmatpush3.msra.mxu0 %v267_v0  ;;  %750 = vmatprep.subr.bf16.mxu1 %v909_v1  ;;  %s700_s14 = sshll.u32 %s252_s11, 3  ;;  %v348_v8 = vld [vmem:[%s1176_s3 + $0x28] sm:$0xff]  ;;  %v347_v9 = vld [vmem:[%s1176_s3 + $0x20] sm:$0xff]  ;;  %v346_v10 = vld [vmem:[%s1176_s3 + $0x18] sm:$0xff]  ;;  %s248_s11 = sand.u32 1, %s891_s19  }
  0x17   : > { %729 = vmatprep.subr.mxu0 %v909_v1  ;;  %766 = vmatprep.mubr.msk.bf16.mxu1 %vm910_vm0, %v909_v1  ;;  %s257_s25 = scalar_lea.vmem %s1173_s0, %s700_s14  ;;  %v345_v11 = vld [vmem:[%s1176_s3 + $0x10] sm:$0xff]  ;;  %s261_s27 = scalar_lea.vmem %s1174_s1, %s700_s14  ;;  %v344_v12 = vld [vmem:[%s1176_s3 + $0x8] sm:$0xff]  ;;  %v343_v13 = vld [vmem:[%s1176_s3] sm:$0xff] }
  0x18   : > { %730 = vmatpush3.msra.mxu0 %v266_v2  ;;  %v1022_v5 = vld [vmem:[%s257_s25] sm:$0xff]  ;;  %v543_v33 = vld [vmem:[%s1177_s4 + $0x70] sm:$0xff]  ;;  %v544_v34 = vld [vmem:[%s1177_s4 + $0x78] sm:$0xff]  ;;  %s699_s12 = sshll.u32 %s248_s11, 3  ;;  %s1126_s25 = scalar_lea.hbm %s1178_s5, %s706_s13 }
  0x19   : > { %731 = vmatprep.subr.mxu0 %v909_v1  ;;  %v342_v14 = vld [vmem:[%s261_s27] sm:$0xff]  ;;  %v552_v36 = vpack.c.bf16 %v544_v34, %v543_v33  ;;  %v542_v37 = vld [vmem:[%s1177_s4 + $0x68] sm:$0xff]  ;;  %v539_v39 = vld [vmem:[%s1177_s4 + $0x50] sm:$0xff]  ;;  %s250_s15 = scalar_lea.vmem [#allocation2], %s699_s12  ;;  %s597_s21 = scalar_lea.sflag [#allocation3], %s248_s11 }
  0x1a   : > { %732 = vmatpush3.msra.mxu0 %v265_v3  ;;  %v541_v35 = vld [vmem:[%s1177_s4 + $0x60] sm:$0xff]  ;;  %v540_v40 = vld [vmem:[%s1177_s4 + $0x58] sm:$0xff]  ;;  %v538_v43 = vld [vmem:[%s1177_s4 + $0x48] sm:$0xff]  ;;  %s611_s16 = sshll.u32 %s250_s15, 4  ;;  %s1128_s16 = int_to_ptr.vmem [resolvable:$true] %s611_s16 }
  0x1b   : > { %733 = vmatprep.subr.mxu0 %v909_v1  ;;  %751 = vmatpush3.bf16.msra.mxu1 %v552_v36  ;;  %v551_v38 = vpack.c.bf16 %v542_v37, %v541_v35  ;;  %v550_v41 = vpack.c.bf16 %v540_v40, %v539_v39  ;;  %v537_v42 = vld [vmem:[%s1177_s4 + $0x40] sm:$0xff]  ;;  %v535_v45 = vld [vmem:[%s1177_s4 + $0x30] sm:$0xff]  ;;  %v536_v46 = vld [vmem:[%s1177_s4 + $0x38] sm:$0xff]  ;;  %s831_s27 = scalar_lea.vmem %s1128_s16, 128  ;;  %p838_p1 = scmp.lt.s32.totalorder %s1128_s16, %s836_s7 }
  0x1c   : > { %734 = vmatpush3.msra.mxu0 %v264_v4  ;;  %752 = vmatprep.subr.bf16.mxu1 %v909_v1  ;;  %v549_v44 = vpack.c.bf16 %v538_v43, %v537_v42  ;;  %v548_v47 = vpack.c.bf16 %v536_v46, %v535_v45  ;;  %v533_v48 = vld [vmem:[%s1177_s4 + $0x20] sm:$0xff]  ;;  %v534_v49 = vld [vmem:[%s1177_s4 + $0x28] sm:$0xff]  ;;  %v531_v51 = vld [vmem:[%s1177_s4 + $0x10] sm:$0xff]  ;;  %p832_p12 = scmp.ne.s32.totalorder %s1128_s16, %s831_s27  ;;  %p839_p2 = scmp.lt.s32.totalorder %s837_s8, %s831_s27 }
  0x1d   : > { %736 = vmatmul.mubr.msk.f32.vlgmr.msra.gmra.mxu0 %vm268_vm1, %v1022_v5  ;;  %378 = vmatprep.subr.mxu0 %v350_v6  ;;  %v547_v50 = vpack.c.bf16 %v534_v49, %v533_v48  ;;  %v532_v52 = vld [vmem:[%s1177_s4 + $0x18] sm:$0xff]  ;;  %v529_v58 = vld [vmem:[%s1177_s4] sm:$0xff]  ;;  %v530_v59 = vld [vmem:[%s1177_s4 + $0x8] sm:$0xff] }
  0x1e   : > { %379 = vmatpush1.msra.mxu0 %v349_v7  ;;  %418 = vmatprep.mubr.f32.mxu0 %v909_v1  ;;  %v546_v53 = vpack.c.bf16 %v532_v52, %v531_v51  ;;  %v545_v60 = vpack.c.bf16 %v530_v59, %v529_v58  ;;  %p833_p13 = pnand %p832_p12, %p982_p4  ;;  %p840_p3 = por %p839_p2, %p838_p1 }
  0x1f   : > { %380 = vmatprep.subr.mxu0 %v348_v8  ;;  %753 = vmatpush3.bf16.msra.mxu1 %v551_v38 }
  0x20   : > { %381 = vmatpush1.msra.mxu0 %v347_v9  ;;  %754 = vmatprep.subr.bf16.mxu1 %v909_v1  ;;  %p834_p0 = pneg %p833_p13 }
  0x21   : > { %382 = vmatprep.subr.mxu0 %v346_v10 }
  0x22   : > { %383 = vmatpush1.msra.mxu0 %v345_v11  ;;  %p841_p5 = pnand %p840_p3, %p834_p0 }
  0x23   : > { %384 = vmatprep.subr.mxu0 %v344_v12  ;;  %755 = vmatpush3.bf16.msra.mxu1 %v550_v41 }
  0x24   : > { %385 = vmatpush1.msra.mxu0 %v343_v13  ;;  %756 = vmatprep.subr.bf16.mxu1 %v909_v1 }
  0x25   : > { %703 = vmatmul.mubr.msk.f32.vlgmr.msra.gmra.mxu0 %vm268_vm1, %v342_v14  ;;  %738 = vmatprep.subr.bf16.mxu0 %v909_v1 }
  0x26   : > { %740 = vmatprep.mubr.msk.bf16.mxu0 %vm910_vm0, %v909_v1 }
  0x27   : > { %757 = vmatpush3.bf16.msra.mxu1 %v549_v44 }
  0x28   : > { %758 = vmatprep.subr.bf16.mxu1 %v909_v1 }
  0x2b   : > { %759 = vmatpush3.bf16.msra.mxu1 %v548_v47 }
  0x2c   : > { %760 = vmatprep.subr.bf16.mxu1 %v909_v1 }
  0x2f   : > { %761 = vmatpush3.bf16.msra.mxu1 %v547_v50 }
  0x30   : > { %762 = vmatprep.subr.bf16.mxu1 %v909_v1 }
  0x33   : > { %763 = vmatpush3.bf16.msra.mxu1 %v546_v53 }
  0x34   : > { %764 = vmatprep.subr.bf16.mxu1 %v909_v1 }
  0x37   : > { %765 = vmatpush3.bf16.msra.mxu1 %v545_v60 }
  0xdd   : > { %v338_v15 = vpop.f32.mrf.mxu0 }
  0xde   : > { %v425_v21 = vpack.c.bf16 %v338_v15, %v338_v15 }
  0xdf   : > { %v737_v16 = vpop.f32.mrf.mxu0 }
  0xe5   : > { %v420_v17 = vpop.f32.mrf.mxu0 }
  0xe6   : > { %v426_v18 = vpack.c.bf16 %v420_v17, %v420_v17 }
  0xe7   : > { %v422_v19 = vpop.f32.mrf.mxu0 }
  0xe8   : > { %739 = vmatpush3.bf16.xpose.msra.mxu0 %v426_v18  ;;  %v480_v20 = vpack.c.bf16 %v422_v19, %v422_v19 }
  0xe9   : > { %744 = vmatprep.subr.bf16.mxu0 %v909_v1 }
  0xea   : > { %v486_v22 = vsel %vm484_vm2, %v480_v20, 0 }
  0xef   : > { %741 = vmatmul.mubr.bf16.vlgmr.msra.gmra.mxu0 %v425_v21 }
  0xf0   : > { %745 = vmatpush3.bf16.msra.mxu0 %v486_v22  ;;  %746 = vmatprep.mubr.msk.bf16.mxu0 %vm910_vm0, %v909_v1 }
 0x1af   : > { %v461_v23 = vpop.f32.mrf.mxu0 }
 0x1b0   : > { %v468_v24 = vsel %vm467_vm3, %v461_v23, -inf }
 0x1b1   : > { %469 = vmax.xlane.f32.xlu0 %v468_v24  ;;  %v742_v25 = vpop.f32.mrf.mxu0 }
 0x1b3   : > { %v464_v26 = vpop.f32.mrf.mxu0 }
 0x1b5   : > { %v743_v27 = vpop.f32.mrf.mxu0 }
 0x23a   : > { %v470_v28 = vpop.xlane.xlu0 %469 }
 0x23b   : > { %v471_v29 = vsub.f32 %v461_v23, %v470_v28 }
 0x23d   : > { %v472_v30 = vmul.f32 1.442695, %v471_v29 }
 0x23f   : > { %827 = vpow2.f32 %v472_v30 }
 0x24c   : > { %v828_v31 = vpop.eup %827 }
 0x24d   : > { %v474_v32 = vsel %vm467_vm3, %v828_v31, 0.0 }
 0x24e   : > { %475 = vadd.xlane.f32.xlu0 %v474_v32 }
 0x2d7   : > { %v476_v54 = vpop.xlane.xlu0 %475 }
 0x2d8   : > { %829 = vrcp.f32 %v476_v54 }
 0x2e5   : > { %v830_v55 = vpop.eup %829 }
 0x2e6   : > { %v478_v56 = vmul.f32 %v830_v55, %v828_v31 }
 0x2e8   : > { %v479_v57 = vpack.c.bf16 %v478_v56, %v478_v56 }
 0x2ea   : > { %747 = vmatmul.mubr.msk.bf16.vlgmr.msra.gmra.mxu0 %vm467_vm3, %v479_v57 }
 0x3aa   : > { %v522_v61 = vpop.f32.mrf.mxu0 }
 0x3ab   : > { %v528_v62 = vpack.c.bf16 %v522_v61, %v522_v61 }
 0x3ac   : > { %v748_v63 = vpop.f32.mrf.mxu0 }
 0x3ad   : > { %767 = vmatmul.mubr.bf16.vlgmr.msra.gmra.mxu1 %v528_v62 }
 0x3ae   : > { %v525_v0 = vpop.f32.mrf.mxu0 }
 0x3b0   : > { %v749_v1 = vpop.f32.mrf.mxu0 }
 0x46d   : > { %v587_v2 = vpop.f32.mrf.mxu1 }
 0x46e   : > { %v594_v3 = vadd.f32 %v587_v2, %v1022_v5 }
 0x46f   : > { %v768_v4 = vpop.f32.mrf.mxu1 }
 0x470   : > { %595 = vst.msk [vmem:[%s250_s15] sm:$0xff] %vm268_vm1, %v594_v3 }
 0x471   : > { %v590_v6 = vpop.f32.mrf.mxu1 }
 0x472   : > { %844 = shalt.err (!%p841_p5)
}
 0x473   : > { %s845_s9 = scalar_lea.hbm %s1126_s25, 128  ;;  %s849_s11 = scalar_lea.hbm %s1178_s5, 256 }
 0x474   : > { %p846_p6 = scmp.ne.s32.totalorder %s1126_s25, %s845_s9  ;;  %p850_p10 = scmp.lt.s32.totalorder %s1126_s25, %s1178_s5 }
 0x475   : > { %p851_p11 = scmp.lt.s32.totalorder %s849_s11, %s845_s9 }
 0x476   : > { %p847_p7 = pnand %p846_p6, %p982_p4 }
 0x477   : > { %p852_p12 = por %p851_p11, %p850_p10 }
 0x478   : > { %p848_p9 = pneg %p847_p7 }
 0x47a   : > { %p853_p13 = pnand %p852_p12, %p848_p9 }
 0x47c   : > { %856 = shalt.err (!%p853_p13)
}
 0x47d   : > { %770 = dma.vmem_to_hbm [thread:$0]  (%p982_p4), %s1128_s16, 128, %s1126_s25, %s597_s21   ;;  %v769_v5 = vpop.f32.mrf.mxu1 }
 0x47e PF: > { %p776_p0 = scmp.ge.s32.totalorder %s907_s23, 2  ;;  %s623_s15 = sand.u32 1, %s887_s18  }
 0x47f   : > { %s624_s17 = scalar_lea.sflag [#allocation3], %s623_s15 }
 0x480   : > { %p773_p1 = pnand %p776_p0, %p989_p8 }
 0x482   : > { %p774_p2 = pneg %p773_p1 }
 0x484   : > { %882 = dma.done.wait (%p774_p2), %s624_s17, 128  }
 0x485   : > { %884 = vsyncadd (%p774_p2), %s624_s17, 4294967168  ;;  %s18_s23 = sadd.s32 1, %s907_s23   ;;  %s1181_s18 = smov %s891_s19 }
 0x486   : > { %p15_p3 = scmp.ge.s32.totalorder %s18_s23, 4   ;;  %s1182_s19 = smov %s895_s20 }
 0x487   : > { %s1183_s20 = smov %s995_s6  ;;  %s1184_s21 = smov %s903_s22 }
 0x488   : > { %s1185_s22 = smov %s1187_s26  ;;  %17 = sbr.rel (!%p15_p3) target bundleno = 4 (0x4), region = 78 }
 0x48d   :  { %629 = vsyncpa [#allocation3], 1 }
 0x48e   :  { %631 = vsyncpa [#allocation3 + $0x1], 1 }

</bundles_post_ra>
